<compile_context>
chip_gen: v7x
topology: tpu7x:2x2x1
jax: 0.10.0
libtpu: 0.0.40
codegen_flags: <defaults>
</compile_context>

<pallas_src>
import jax
import jax.numpy as jnp
from jax.experimental import pallas as pl
from jax.experimental.pallas import tpu as pltpu

LANE = 128  # lane width / class-dim padding target


def toplayer_kernel(x_ref, w_ref, o_ref):
    # Fused ReLU (VPU) + matmul (MXU, bf16 inputs, f32 accumulation).
    x = jnp.maximum(x_ref[...], 0.0).astype(jnp.bfloat16)
    o_ref[...] = jnp.dot(x, w_ref[...], preferred_element_type=jnp.float32)


def prepare_toplayer_params(weight):
    """One-time (init) weight prep.

    weight: (nb_classes, D) f32 in PyTorch nn.Linear layout.
    Returns (D, N_pad) bf16, pre-transposed and zero-padded to a lane-dense class dim.
    """
    nb_classes, D = weight.shape
    n_pad = pl.cdiv(nb_classes, LANE) * LANE
    w_prep = jnp.zeros((D, n_pad), dtype=jnp.bfloat16)
    w_prep = w_prep.at[:, :nb_classes].set(weight.T.astype(jnp.bfloat16))
    return w_prep


def toplayer_forward(x, w_prepared, nb_classes):
    """x: (B, D) f32; w_prepared: (D, N_pad) bf16 from prepare_toplayer_params."""
    B, D = x.shape
    N_pad = w_prepared.shape[1]

    # Batch tiling: one block at small B, 256-row tiles (MXU height on v6e/v7x) at
    # large B so Pallas can double-buffer the x DMA and shard across TensorCores.
    bm = 256 if B > 256 else max(8, B)
    B_pad = pl.cdiv(B, bm) * bm
    if B_pad != B:
        x = jnp.pad(x, ((0, B_pad - B), (0, 0)))

    grid = (B_pad // bm,)

    out = pl.pallas_call(
        toplayer_kernel,
        out_shape=jax.ShapeDtypeStruct((B_pad, N_pad), jnp.float32),
        grid_spec=pl.GridSpec(
            grid=grid,
            in_specs=[
                pl.BlockSpec((bm, D), lambda i: (i, 0)),        # x tile marches over batch
                pl.BlockSpec((D, N_pad), lambda i: (0, 0)),     # W resident across all steps
            ],
            out_specs=pl.BlockSpec((bm, N_pad), lambda i: (i, 0)),
        ),
        compiler_params=pltpu.CompilerParams(
            dimension_semantics=("parallel",),
        ),
    )(x, w_prepared)

    return out[:B, :nb_classes]


if __name__ == "__main__":
    key = jax.random.PRNGKey(0)
    kx, kw = jax.random.split(key)

    batch = 8
    linear_in = 256 + 256  # 512, as in the module
    nb_classes = 10

    # Deterministic synthetic init (nn.Linear weight shape: (out, in), bias=False).
    x = jax.random.normal(kx, (batch, linear_in), dtype=jnp.float32)
    bound = 1.0 / (linear_in ** 0.5)
    weight = jax.random.uniform(
        kw, (nb_classes, linear_in), minval=-bound, maxval=bound, dtype=jnp.float32
    )

    # Init-time weight prep (transpose + pad + bf16 cast happens once, not per call).
    w_prepared = prepare_toplayer_params(weight)

    out = toplayer_forward(x, w_prepared, nb_classes)
    out = jax.block_until_ready(out)

    # Reference check against the f32 F.relu + nn.Linear(bias=False) math.
    ref = jnp.maximum(x, 0.0) @ weight.T
    assert out.shape == (batch, nb_classes)
    # bf16 MXU inputs with f32 accumulation -> slightly relaxed tolerance.
    assert jnp.allclose(out, ref, atol=2e-2, rtol=2e-2)

    print("KERNEL_OK")
</pallas_src>

<mosaic_0001>
module attributes {stable_mosaic.version = 11 : i64} {
  func.func @toplayer_kernel(%arg0: i32, %arg1: memref<8x512xf32, #tpu.memory_space<vmem>>, %arg2: memref<512x128xbf16, #tpu.memory_space<vmem>>, %arg3: memref<8x128xf32, #tpu.memory_space<vmem>>) attributes {dimension_semantics = [#tpu.dimension_semantics<parallel>], iteration_bounds = array<i64: 1>, scalar_prefetch = 0 : i64, scratch_operands = 0 : i64, tpu.core_type = #tpu.core_type<tc>, window_params = [{transform_indices = @transform_0, window_bounds = array<i64: 8, 512>}, {pipeline_mode = #tpu.pipeline_mode<synchronous>, transform_indices = @transform_1, window_bounds = array<i64: 512, 128>}, {transform_indices = @transform_2, window_bounds = array<i64: 8, 128>}]} {
    %c0 = arith.constant 0 : index
    %c0_0 = arith.constant 0 : index
    %0 = vector.load %arg1[%c0, %c0_0] : memref<8x512xf32, #tpu.memory_space<vmem>>, vector<8x512xf32>
    %cst = arith.constant 0.000000e+00 : f32
    %1 = vector.broadcast %cst : f32 to vector<8x512xf32>
    %2 = arith.maximumf %0, %1 : vector<8x512xf32>
    %3 = arith.truncf %2 : vector<8x512xf32> to vector<8x512xbf16>
    %c0_1 = arith.constant 0 : index
    %c0_2 = arith.constant 0 : index
    %4 = vector.load %arg2[%c0_1, %c0_2] : memref<512x128xbf16, #tpu.memory_space<vmem>>, vector<512x128xbf16>
    %cst_3 = arith.constant dense<0.000000e+00> : vector<8x128xf32>
    %5 = tpu.matmul %3, %4, %cst_3 {dimension_numbers = #tpu.dot_dimension_numbers<[1], [0], [0], [1], [0, 0, 1, 1], [], []>} : vector<8x512xbf16>, vector<512x128xbf16>, vector<8x128xf32> -> vector<8x128xf32>
    %c0_4 = arith.constant 0 : index
    %c0_5 = arith.constant 0 : index
    %6 = vector.load %arg3[%c0_4, %c0_5] : memref<8x128xf32, #tpu.memory_space<vmem>>, vector<8x128xf32>
    tpu.vector_store %arg3[%c0_4, %c0_5], %5 {strides = array<i32>} : memref<8x128xf32, #tpu.memory_space<vmem>>, vector<8x128xf32>,
    return
  }
  func.func @transform_0(%arg0: i32) -> (i32, i32) {
    %c0_i32 = arith.constant 0 : i32
    %c0_i32_0 = arith.constant 0 : i32
    return %arg0, %c0_i32 : i32, i32
  }
  func.func @transform_1(%arg0: i32) -> (i32, i32) {
    %c0_i32 = arith.constant 0 : i32
    %c0_i32_0 = arith.constant 0 : i32
    %c0_i32_1 = arith.constant 0 : i32
    return %c0_i32, %c0_i32_0 : i32, i32
  }
  func.func @transform_2(%arg0: i32) -> (i32, i32) {
    %c0_i32 = arith.constant 0 : i32
    %c0_i32_0 = arith.constant 0 : i32
    return %arg0, %c0_i32 : i32, i32
  }
}

</mosaic_0001>

<bundles_post_ra>
// kernel: tpu_custom_call.1
= control target key start
LH: loop header
LB: loop body
LE: loop exit
PB: predicated region body
PF: predicated region fallthrough
CT: control target
= control target key end

     0   :  { %7 = vsyncpa [#allocation3], 0  ;;  %s652_s0 = inlined_call_operand.hbm [shape: f32[8,512], index: 0, kind: input, shape index: {}]   ;;  %s653_s1 = inlined_call_operand.hbm [shape: bf16[512,128], index: 1, kind: input, shape index: {}]   ;;  %s654_s2 = inlined_call_operand.hbm [shape: f32[8,128], index: 2, kind: output, shape index: {}]  }
   0x1   :  { %8 = vsyncpa [#allocation6], 0 }
   0x2   :  { %9 = vsyncpa [#allocation4], 0  ;;  %s589_s9 = smov [#allocation2]   ;;  %s590_s11 = smov [#allocation5]  }
   0x3   :  { %s16_s10 = sshll.u32 %s589_s9, 4  ;;  %s25_s12 = sshll.u32 %s590_s11, 4  ;;  %s17_s10 = int_to_ptr.vmem [resolvable:$true] %s16_s10  ;;  %s609_s12 = int_to_ptr.vmem [resolvable:$true] %s25_s12 }
   0x4   :  { %s517_s15 = scalar_lea.hbm %s652_s0, 512 }
   0x5   :  { %p518_p0 = scmp.ne.s32.totalorder %s652_s0, %s517_s15  ;;  %p521_p1 = scmp.lt.u32.totalorder %s517_s15, %s652_s0 }
   0x7   :  { %p523_p2 = pnand %p521_p1, %p518_p0 }
   0x9   :  { %526 = shalt.err (!%p523_p2)
}
   0xa   :  { %s527_s20 = scalar_lea.vmem %s17_s10, 512  ;;  %p532_p4 = scmp.lt.s32.totalorder %s17_s10, %s17_s10 }
   0xb   :  { %p528_p3 = scmp.ne.s32.totalorder %s17_s10, %s527_s20  ;;  %p533_p5 = scmp.lt.s32.totalorder %s527_s20, %s527_s20 }
   0xd   :  { %p534_p6 = por %p533_p5, %p532_p4 }
   0xf   :  { %p535_p7 = pnand %p534_p6, %p528_p3 }
  0x11   :  { %538 = shalt.err (!%p535_p7)
}
  0x12   :  { %19 = dma.hbm_to_vmem [thread:$0]  %s652_s0, 512, %s17_s10, [#allocation3]  }
  0x13   :  { %s539_s25 = scalar_lea.hbm %s653_s1, 4096 }
  0x14   :  { %p540_p8 = scmp.ne.s32.totalorder %s653_s1, %s539_s25  ;;  %p543_p9 = scmp.lt.u32.totalorder %s539_s25, %s653_s1 }
  0x16   :  { %p545_p10 = pnand %p543_p9, %p540_p8 }
  0x18   :  { %548 = shalt.err (!%p545_p10)
}
  0x19   :  { %s549_s30 = scalar_lea.vmem %s609_s12, 4096  ;;  %p554_p12 = scmp.lt.s32.totalorder %s609_s12, %s609_s12 }
  0x1a   :  { %p550_p11 = scmp.ne.s32.totalorder %s609_s12, %s549_s30  ;;  %p555_p13 = scmp.lt.s32.totalorder %s549_s30, %s549_s30 }
  0x1c   :  { %p556_p0 = por %p555_p13, %p554_p12 }
  0x1e   :  { %p557_p1 = pnand %p556_p0, %p550_p11 }
  0x20   :  { %560 = shalt.err (!%p557_p1)
}
  0x21   :  { %s591_s0 = smov 64   ;;  %s592_s3 = smov 4  }
  0x22   :  { %31 = dma.hbm_to_vmem [thread:$0]  %s653_s1, 4096, %s609_s12, [#allocation6], %s591_s0, %s591_s0, %s592_s3  }
  0x23   :  { %583 = dma.done.wait [#allocation3], 512  }
  0x24   :  { %584 = vsyncadd [#allocation3], 4294966784 }
  0x25   :  { %585 = dma.done.wait [#allocation6], 4096  }
  0x26   :  { %586 = vsyncadd [#allocation6], 4294963200  ;;  %v485_v0 = vld [vmem:[#allocation5 + $0x40] sm:$0xff]   ;;  %v489_v4 = vld [vmem:[#allocation5 + $0x48] sm:$0xff]   ;;  %s593_s1 = smov [#allocation7]  }
  0x27   :  { %v486_v1 = vld [vmem:[#allocation5 + $0xc0] sm:$0xff]   ;;  %436 = vmatprep.subr.bf16.mxu0 %v485_v0  ;;  %v490_v5 = vld [vmem:[#allocation5 + $0xc8] sm:$0xff]   ;;  %v493_v8 = vld [vmem:[#allocation5 + $0x50] sm:$0xff]   ;;  %s394_s6 = sshll.u32 %s593_s1, 4  ;;  %s395_s6 = int_to_ptr.vmem [resolvable:$true] %s394_s6 }
  0x28   :  { %v487_v2 = vld [vmem:[#allocation5] sm:$0xff]   ;;  %458 = vmatprep.subr.bf16.mxu1 %v486_v1  ;;  %v491_v6 = vld [vmem:[#allocation5 + $0x8] sm:$0xff]   ;;  %v494_v9 = vld [vmem:[#allocation5 + $0xd0] sm:$0xff]   ;;  %s561_s7 = scalar_lea.vmem %s395_s6, 128  ;;  %p566_p3 = scmp.lt.s32.totalorder %s395_s6, %s395_s6 }
  0x29   :  { %v488_v3 = vld [vmem:[#allocation5 + $0x80] sm:$0xff]   ;;  %437 = vmatpush3.bf16.msra.mxu0 %v487_v2  ;;  %v492_v7 = vld [vmem:[#allocation5 + $0x88] sm:$0xff]   ;;  %v495_v10 = vld [vmem:[#allocation5 + $0x10] sm:$0xff]   ;;  %p562_p2 = scmp.ne.s32.totalorder %s395_s6, %s561_s7  ;;  %p567_p4 = scmp.lt.s32.totalorder %s561_s7, %s561_s7 }
  0x2a   :  { %459 = vmatpush3.bf16.msra.mxu1 %v488_v3  ;;  %438 = vmatprep.subr.bf16.mxu0 %v489_v4  ;;  %v496_v11 = vld [vmem:[#allocation5 + $0x90] sm:$0xff]   ;;  %v497_v12 = vld [vmem:[#allocation5 + $0x58] sm:$0xff]   ;;  %v501_v16 = vld [vmem:[#allocation5 + $0x60] sm:$0xff]  }
  0x2b   :  { %460 = vmatprep.subr.bf16.mxu1 %v490_v5  ;;  %v498_v13 = vld [vmem:[#allocation5 + $0xd8] sm:$0xff]   ;;  %v502_v17 = vld [vmem:[#allocation5 + $0xe0] sm:$0xff]   ;;  %v505_v20 = vld [vmem:[#allocation5 + $0x68] sm:$0xff]   ;;  %p568_p5 = por %p567_p4, %p566_p3 }
  0x2c   :  { %v499_v14 = vld [vmem:[#allocation5 + $0x18] sm:$0xff]   ;;  %v503_v18 = vld [vmem:[#allocation5 + $0x20] sm:$0xff]   ;;  %v506_v21 = vld [vmem:[#allocation5 + $0xe8] sm:$0xff]  }
  0x2d   :  { %439 = vmatpush3.bf16.msra.mxu0 %v491_v6  ;;  %v500_v15 = vld [vmem:[#allocation5 + $0x98] sm:$0xff]   ;;  %v504_v19 = vld [vmem:[#allocation5 + $0xa0] sm:$0xff]   ;;  %v507_v22 = vld [vmem:[#allocation5 + $0x28] sm:$0xff]   ;;  %p569_p6 = pnand %p568_p5, %p562_p2 }
  0x2e   :  { %461 = vmatpush3.bf16.msra.mxu1 %v492_v7  ;;  %440 = vmatprep.subr.bf16.mxu0 %v493_v8  ;;  %v508_v23 = vld [vmem:[#allocation5 + $0xa8] sm:$0xff]   ;;  %v509_v24 = vld [vmem:[#allocation5 + $0x70] sm:$0xff]   ;;  %v513_v28 = vld [vmem:[#allocation5 + $0x78] sm:$0xff]  }
  0x2f   :  { %462 = vmatprep.subr.bf16.mxu1 %v494_v9  ;;  %v510_v25 = vld [vmem:[#allocation5 + $0xf0] sm:$0xff]   ;;  %v514_v29 = vld [vmem:[#allocation5 + $0xf8] sm:$0xff]   ;;  %v40_v32 = vld [vmem:[#allocation2 + $0x8] sm:$0xff] }
  0x30   :  { %v511_v26 = vld [vmem:[#allocation5 + $0x30] sm:$0xff]   ;;  %v515_v30 = vld [vmem:[#allocation5 + $0x38] sm:$0xff]   ;;  %v39_v34 = vld [vmem:[#allocation2] sm:$0xff]  ;;  %v44_v35 = vmax.f32 %v40_v32, 0.0 }
  0x31   :  { %441 = vmatpush3.bf16.msra.mxu0 %v495_v10  ;;  %v512_v27 = vld [vmem:[#allocation5 + $0xb0] sm:$0xff]   ;;  %v516_v31 = vld [vmem:[#allocation5 + $0xb8] sm:$0xff]   ;;  %v43_v37 = vmax.f32 %v39_v34, 0.0 }
  0x32   :  { %463 = vmatpush3.bf16.msra.mxu1 %v496_v11  ;;  %442 = vmatprep.subr.bf16.mxu0 %v497_v12  ;;  %v42_v33 = vld [vmem:[#allocation2 + $0x18] sm:$0xff]  ;;  %v41_v38 = vld [vmem:[#allocation2 + $0x10] sm:$0xff]  ;;  %v48_v40 = vpack.c.bf16 %v44_v35, %v44_v35 }
  0x33   :  { %464 = vmatprep.subr.bf16.mxu1 %v498_v13  ;;  %v46_v36 = vmax.f32 %v42_v33, 0.0  ;;  %v45_v39 = vmax.f32 %v41_v38, 0.0  ;;  %v47_v42 = vpack.c.bf16 %v43_v37, %v43_v37 }
  0x34   :  { %339 = vmatprep.mubr.bf16.mxu0 %v48_v40 }
  0x35   :  { %443 = vmatpush3.bf16.msra.mxu0 %v499_v14  ;;  %v50_v41 = vpack.c.bf16 %v46_v36, %v46_v36  ;;  %v49_v43 = vpack.c.bf16 %v45_v39, %v45_v39 }
  0x36   :  { %465 = vmatpush3.bf16.msra.mxu1 %v500_v15  ;;  %444 = vmatprep.subr.bf16.mxu0 %v501_v16 }
  0x37   :  { %466 = vmatprep.subr.bf16.mxu1 %v502_v17  ;;  %379 = vmatprep.mubr.bf16.mxu1 %v50_v41 }
  0x39   :  { %445 = vmatpush3.bf16.msra.mxu0 %v503_v18 }
  0x3a   :  { %467 = vmatpush3.bf16.msra.mxu1 %v504_v19  ;;  %446 = vmatprep.subr.bf16.mxu0 %v505_v20 }
  0x3b   :  { %468 = vmatprep.subr.bf16.mxu1 %v506_v21 }
  0x3d   :  { %447 = vmatpush3.bf16.msra.mxu0 %v507_v22 }
  0x3e   :  { %469 = vmatpush3.bf16.msra.mxu1 %v508_v23  ;;  %448 = vmatprep.subr.bf16.mxu0 %v509_v24 }
  0x3f   :  { %470 = vmatprep.subr.bf16.mxu1 %v510_v25 }
  0x41   :  { %449 = vmatpush3.bf16.msra.mxu0 %v511_v26 }
  0x42   :  { %471 = vmatpush3.bf16.msra.mxu1 %v512_v27  ;;  %450 = vmatprep.subr.bf16.mxu0 %v513_v28 }
  0x43   :  { %472 = vmatprep.subr.bf16.mxu1 %v514_v29 }
  0x45   :  { %451 = vmatpush3.bf16.msra.mxu0 %v515_v30 }
  0x46   :  { %473 = vmatpush3.bf16.msra.mxu1 %v516_v31 }
  0x48   :  { %340 = vmatmul.mubr.bf16.vlgmr.msra.gmra.mrb[0].mxu0 %v47_v42 }
  0x49   :  { %380 = vmatmul.mubr.bf16.vlgmr.msra.gmra.mrb[0].mxu1 %v49_v43 }
 0x11b   :  { %v452_v44 = vpop.f32.mrb[0].mxu0 }
 0x11c   :  { %v474_v45 = vpop.f32.mrb[0].mxu1  ;;  %v453_v46 = vpop.f32.mrb[1].mxu0 }
 0x11d   :  { %v475_v47 = vpop.f32.mrb[1].mxu1  ;;  %v454_v48 = vadd.f32 %v453_v46, %v452_v44  ;;  %v455_v50 = vpop.f32.mrb[2].mxu0 }
 0x11e   :  { %v476_v49 = vadd.f32 %v475_v47, %v474_v45  ;;  %v477_v51 = vpop.f32.mrb[2].mxu1  ;;  %v456_v52 = vpop.f32.mrb[3].mxu0 }
 0x11f   :  { %v478_v53 = vpop.f32.mrb[3].mxu1 }
 0x120   :  { %v382_v54 = vadd.f32 %v476_v49, %v454_v48 }
 0x122   :  { %387 = vst [vmem:[#allocation7] sm:$0xff] %v382_v54 }
 0x123   :  { %572 = shalt.err (!%p569_p6)
}
 0x124   :  { %s573_s10 = scalar_lea.hbm %s654_s2, 128 }
 0x125   :  { %p574_p7 = scmp.ne.s32.totalorder %s654_s2, %s573_s10  ;;  %p577_p8 = scmp.lt.u32.totalorder %s573_s10, %s654_s2 }
 0x127   :  { %p579_p9 = pnand %p577_p8, %p574_p7 }
 0x129   :  { %582 = shalt.err (!%p579_p9)
}
 0x12a   :  { %397 = dma.vmem_to_hbm [thread:$0]  %s395_s6, 128, %s654_s2, [#allocation4]  }
 0x12b   :  { %587 = dma.done.wait [#allocation4], 128  }
 0x12c   :  { %588 = vsyncadd [#allocation4], 4294967168 }
 0x12d   :  { %401 = vsyncpa [#allocation3], 1 }
 0x12e   :  { %402 = vsyncpa [#allocation6], 1 }
 0x12f   :  { %403 = vsyncpa [#allocation4], 1 }

</bundles_post_ra>
